<compile_context>
chip_gen: v6e
topology: v6e:2x2x1
jax: 0.10.0
libtpu: 0.0.40
codegen_flags: <defaults>
</compile_context>

<pallas_src>
import functools

import jax
import jax.numpy as jnp
from jax.experimental import pallas as pl
from jax.experimental.pallas import tpu as pltpu

_LANES = 128


def _round_up(n, m):
    return ((n + m - 1) // m) * m


def _cdiv(a, b):
    return (a + b - 1) // b


# ----------------------------------------------------------------------------
# Pallas kernel
# ----------------------------------------------------------------------------
def _layer_norm(h, gamma, beta, eps=1e-5):
    # single-pass: mu = E[h], var = E[h^2] - mu^2  (rsqrt goes to the EUP slot)
    mu = jnp.mean(h, axis=-1, keepdims=True)
    ms = jnp.mean(h * h, axis=-1, keepdims=True)
    var = ms - mu * mu
    return (h - mu) * jax.lax.rsqrt(var + eps) * gamma + beta


def qnet_kernel(x_ref, w_ref, r_ref, out_ref, *,
                state_dim, h0, h1, half, action_dim, w_offsets, add_residual):
    o1, o2, o3, o4 = w_offsets
    x = x_ref[...]

    # ---- weights: static slices of the packed [R, 128] buffer (stored [in, out])
    w1 = w_ref[o1:o1 + state_dim, 0:h0]          # Linear(state_dim, h0)
    w2 = w_ref[o2:o2 + h0, 0:h1]                 # Linear(h0, h1)
    ws = w_ref[o3:o3 + h1, 0:2 * half]           # fused [vw1 | aw1]
    wh = w_ref[o4:o4 + 2 * half, :]              # block-diagonal head, 128-wide

    # ---- bias / LayerNorm / mask rows (each [1, width])
    b1, g1, be1 = r_ref[0:1, 0:h0], r_ref[1:2, 0:h0], r_ref[2:3, 0:h0]
    b2, g2, be2 = r_ref[3:4, 0:h1], r_ref[4:5, 0:h1], r_ref[5:6, 0:h1]
    bs, gs, bes = (r_ref[6:7, 0:2 * half], r_ref[7:8, 0:2 * half],
                   r_ref[8:9, 0:2 * half])
    bh = r_ref[9:10, :]                          # head bias, 128-wide (pad cols = 0)
    m_v = r_ref[10:11, 0:2 * half]               # 1s in value-stream lanes [0:half)
    m_a = r_ref[11:12, 0:2 * half]               # 1s in advantage lanes [half:2*half)
    m_adv = r_ref[12:13, :]                      # 1s in head lanes [0:action_dim)
    m_val = r_ref[13:14, :]                      # one-hot at head lane action_dim

    # ---- feature block 1: Linear -> LayerNorm -> ReLU -> (Dropout = identity)
    h = jnp.dot(x, w1, preferred_element_type=jnp.float32) + b1
    h = jnp.maximum(_layer_norm(h, g1, be1), 0.0)

    # ---- feature block 2: Linear -> (+residual iff state_dim == h1) -> LN -> ReLU
    h2 = jnp.dot(h, w2, preferred_element_type=jnp.float32) + b2
    if add_residual:  # static at trace time (shape-equality residual check)
        h2 = h2 + x
    feats = jnp.maximum(_layer_norm(h2, g2, be2), 0.0)

    # ---- fused value|advantage hidden layer (one matmul); per-half LayerNorm via
    #      full-width masked reductions (no lane slices, no concat).
    s = jnp.dot(feats, ws, preferred_element_type=jnp.float32) + bs  # [TB, 2*half]
    eps = 1e-5
    inv_half = 1.0 / half
    s2 = s * s
    mu_v = jnp.sum(s * m_v, axis=-1, keepdims=True) * inv_half        # [TB, 1]
    mu_a = jnp.sum(s * m_a, axis=-1, keepdims=True) * inv_half
    var_v = jnp.sum(s2 * m_v, axis=-1, keepdims=True) * inv_half - mu_v * mu_v
    var_a = jnp.sum(s2 * m_a, axis=-1, keepdims=True) * inv_half - mu_a * mu_a
    mu_full = mu_v * m_v + mu_a * m_a                                 # [TB, 2*half]
    inv_full = (jax.lax.rsqrt(var_v + eps) * m_v +
                jax.lax.rsqrt(var_a + eps) * m_a)
    hid = jnp.maximum((s - mu_full) * inv_full * gs + bes, 0.0)       # [TB, 2*half]

    # ---- fused block-diagonal head (one matmul), lane-dense [TB, 128]:
    #      cols 0..A-1 = advantages, col A = value, cols A+1.. = 0
    head = jnp.dot(hid, wh, preferred_element_type=jnp.float32) + bh

    # value / mean(adv) via masked reductions (no lane slices)
    value = jnp.sum(head * m_val, axis=-1, keepdims=True)
    adv_mean = jnp.sum(head * m_adv, axis=-1, keepdims=True) * (1.0 / action_dim)

    # Q = adv + value - mean(adv) lives in lanes 0..A-1; remaining lanes are
    # don't-care and get sliced off in the wrapper. Full-width unmasked store.
    out_ref[...] = (head + (value - adv_mean)).astype(out_ref.dtype)


# ----------------------------------------------------------------------------
# Parameter init (deterministic, mirrors kaiming_uniform_(fan_in, relu) + zero bias)
# ----------------------------------------------------------------------------
def _kaiming_uniform(key, in_dim, out_dim):
    bound = (6.0 / in_dim) ** 0.5  # gain(relu)=sqrt(2), bound = gain*sqrt(3/fan_in)
    # stored as [in_dim, out_dim] (transposed vs PyTorch) so the kernel does x @ W
    return jax.random.uniform(key, (in_dim, out_dim), jnp.float32, -bound, bound)


def init_params(key, state_dim, action_dim, hidden_dims=(64, 32)):
    h0, h1 = hidden_dims
    half = h1 // 2
    keys = jax.random.split(key, 6)
    return {
        "w1": _kaiming_uniform(keys[0], state_dim, h0),
        "b1": jnp.zeros((1, h0), jnp.float32),
        "g1": jnp.ones((1, h0), jnp.float32),
        "be1": jnp.zeros((1, h0), jnp.float32),
        "w2": _kaiming_uniform(keys[1], h0, h1),
        "b2": jnp.zeros((1, h1), jnp.float32),
        "g2": jnp.ones((1, h1), jnp.float32),
        "be2": jnp.zeros((1, h1), jnp.float32),
        "vw1": _kaiming_uniform(keys[2], h1, half),
        "vb1": jnp.zeros((1, half), jnp.float32),
        "vg1": jnp.ones((1, half), jnp.float32),
        "vbe1": jnp.zeros((1, half), jnp.float32),
        "vw2": _kaiming_uniform(keys[3], half, 1),
        "vb2": jnp.zeros((1, 1), jnp.float32),
        "aw1": _kaiming_uniform(keys[4], h1, half),
        "ab1": jnp.zeros((1, half), jnp.float32),
        "ag1": jnp.ones((1, half), jnp.float32),
        "abe1": jnp.zeros((1, half), jnp.float32),
        "aw2": _kaiming_uniform(keys[5], half, action_dim),
        "ab2": jnp.zeros((1, action_dim), jnp.float32),
    }


# ----------------------------------------------------------------------------
# Host-side parameter packing (do once, reuse across forward calls)
# ----------------------------------------------------------------------------
def pack_params(p, state_dim, action_dim):
    """Pack all layer parameters into two lane-padded buffers.

    wpack: [R, 128] f32 — W1, W2, [vw1|aw1], block-diagonal head weight; each
           block starts at a sublane-aligned (multiple-of-8) row offset.
    rpack: [16, 128] f32 — bias / gamma / beta rows + head bias + mask rows.
    """
    h0 = p["w1"].shape[1]
    h1 = p["w2"].shape[1]
    half = p["vw1"].shape[1]
    assert 2 * half <= _LANES and action_dim + 1 <= _LANES

    def pad_block(a):
        r, c = a.shape
        return jnp.pad(a.astype(jnp.float32), ((0, (-r) % 8), (0, _LANES - c)))

    def pad_row(a):
        return jnp.pad(a.astype(jnp.float32), ((0, 0), (0, _LANES - a.shape[1])))

    # fused stream-1 weight: cols [:half] = value stream, [half:] = advantage stream
    ws = jnp.concatenate([p["vw1"], p["aw1"]], axis=1)               # [h1, 2*half]
    # block-diagonal head: cols 0..A-1 <- advantage head, col A <- value head
    wh = jnp.zeros((2 * half, _LANES), jnp.float32)
    wh = wh.at[half:, :action_dim].set(p["aw2"])
    wh = wh.at[:half, action_dim:action_dim + 1].set(p["vw2"])

    blocks = [pad_block(p["w1"]), pad_block(p["w2"]), pad_block(ws), pad_block(wh)]
    offsets, off = [], 0
    for b in blocks:
        offsets.append(off)
        off += b.shape[0]
    wpack = jnp.concatenate(blocks, axis=0)

    bh = jnp.zeros((1, _LANES), jnp.float32)
    bh = bh.at[0, :action_dim].set(p["ab2"][0])
    bh = bh.at[0, action_dim].set(p["vb2"][0, 0])

    # constant mask rows (avoid in-kernel lane slicing / concat)
    m_v = jnp.zeros((1, _LANES), jnp.float32).at[0, :half].set(1.0)
    m_a = jnp.zeros((1, _LANES), jnp.float32).at[0, half:2 * half].set(1.0)
    m_adv = jnp.zeros((1, _LANES), jnp.float32).at[0, :action_dim].set(1.0)
    m_val = jnp.zeros((1, _LANES), jnp.float32).at[0, action_dim].set(1.0)

    rows = [
        pad_row(p["b1"]), pad_row(p["g1"]), pad_row(p["be1"]),
        pad_row(p["b2"]), pad_row(p["g2"]), pad_row(p["be2"]),
        pad_row(jnp.concatenate([p["vb1"], p["ab1"]], axis=1)),
        pad_row(jnp.concatenate([p["vg1"], p["ag1"]], axis=1)),
        pad_row(jnp.concatenate([p["vbe1"], p["abe1"]], axis=1)),
        bh, m_v, m_a, m_adv, m_val,
    ]
    rpack = jnp.concatenate(rows, axis=0)
    rpack = jnp.pad(rpack, ((0, (-rpack.shape[0]) % 8), (0, 0)))

    meta = dict(state_dim=state_dim, h0=h0, h1=h1, half=half,
                action_dim=action_dim, w_offsets=tuple(offsets))
    return wpack, rpack, meta


# ----------------------------------------------------------------------------
# Wrapper
# ----------------------------------------------------------------------------
def _num_tensorcores():
    """2 on v7x (2 TensorCores/chip), else 1. Best-effort; defaults to 1."""
    try:
        kind = jax.devices()[0].device_kind.lower()
    except Exception:
        return 1
    return 2 if ("v7" in kind or "7x" in kind) else 1


def enhanced_qnetwork_forward(x, wpack, rpack, meta, *,
                              max_batch_tile=1024, out_dtype=jnp.float32):
    if x.ndim == 1:
        x = x[None, :]
    x = x.astype(jnp.float32)
    batch, state_dim = x.shape
    assert state_dim == meta["state_dim"]
    action_dim = meta["action_dim"]
    add_residual = (state_dim == meta["h1"])   # residual iff shapes match (static)

    # ---- batch tiling: TB rows per grid step (multiple of 8).
    #  * big tiles amortize the ~0.35us/step grid overhead (VMEM is nowhere near
    #    the limit even at TB=1024 on v7x's 64 MiB).
    #  * on v7x force >= 2 evenly sized blocks so the "parallel" batch axis
    #    actually feeds both TensorCores; v5e/v6e keep one large tile.
    b8 = _round_up(batch, 8)
    n_cores = _num_tensorcores()
    n_blocks = _cdiv(b8, max_batch_tile)
    if n_cores > 1 and b8 >= n_cores * 8:
        n_blocks = _round_up(max(n_blocks, n_cores), n_cores)
    tb = _round_up(_cdiv(b8, n_blocks), 8)
    b_pad = tb * _cdiv(batch, tb)
    if b_pad != batch:
        x = jnp.pad(x, ((0, b_pad - batch), (0, 0)))

    kernel = functools.partial(
        qnet_kernel,
        state_dim=state_dim, h0=meta["h0"], h1=meta["h1"], half=meta["half"],
        action_dim=action_dim, w_offsets=meta["w_offsets"],
        add_residual=add_residual)

    out = pl.pallas_call(
        kernel,
        out_shape=jax.ShapeDtypeStruct((b_pad, _LANES), out_dtype),
        grid=(b_pad // tb,),
        in_specs=[
            pl.BlockSpec((tb, state_dim), lambda i: (i, 0)),   # x: one tile per step
            pl.BlockSpec(wpack.shape, lambda i: (0, 0)),       # params stay VMEM-resident
            pl.BlockSpec(rpack.shape, lambda i: (0, 0)),
        ],
        out_specs=pl.BlockSpec((tb, _LANES), lambda i: (i, 0)),  # lane-dense output tile
        compiler_params=pltpu.CompilerParams(
            dimension_semantics=("parallel",)),                  # v7x: 2nd TC
    )(x, wpack, rpack)

    return out[:batch, :action_dim]


# ----------------------------------------------------------------------------
# Pure-JAX reference (for a quick sanity check)
# ----------------------------------------------------------------------------
def _ref_forward(x, p):
    def ln(h, g, b, eps=1e-5):
        mu = jnp.mean(h, -1, keepdims=True)
        var = jnp.mean((h - mu) ** 2, -1, keepdims=True)
        return (h - mu) / jnp.sqrt(var + eps) * g + b

    h = jnp.maximum(ln(x @ p["w1"] + p["b1"], p["g1"], p["be1"]), 0.0)
    h2 = h @ p["w2"] + p["b2"]
    if x.shape[1] == p["w2"].shape[1]:
        h2 = h2 + x
    feats = jnp.maximum(ln(h2, p["g2"], p["be2"]), 0.0)
    v = jnp.maximum(ln(feats @ p["vw1"] + p["vb1"], p["vg1"], p["vbe1"]), 0.0)
    value = v @ p["vw2"] + p["vb2"]
    a = jnp.maximum(ln(feats @ p["aw1"] + p["ab1"], p["ag1"], p["abe1"]), 0.0)
    adv = a @ p["aw2"] + p["ab2"]
    return value + adv - jnp.mean(adv, axis=1, keepdims=True)


if __name__ == "__main__":
    STATE_DIM = 8
    ACTION_DIM = 3     # Scale Down / Keep Same / Scale Up
    BATCH = 4

    key = jax.random.PRNGKey(0)
    kx, kp = jax.random.split(key)
    x = jax.random.normal(kx, (BATCH, STATE_DIM), jnp.float32)
    params = init_params(kp, STATE_DIM, ACTION_DIM)

    # Pack once on the host; reuse the packed buffers across forward calls.
    wpack, rpack, meta = pack_params(params, STATE_DIM, ACTION_DIM)

    q = enhanced_qnetwork_forward(x, wpack, rpack, meta)
    q = jax.block_until_ready(q)

    q_ref = _ref_forward(x, params)
    assert q.shape == (BATCH, ACTION_DIM)
    assert jnp.allclose(q, q_ref, atol=1e-4, rtol=1e-4), "mismatch vs JAX reference"

    # TODO(synk): Dropout is identity (eval-mode); stream LN masks divide by
    # `half`, not the padded lane count, so zero-padding never dilutes LN stats.
    print("KERNEL_OK")
</pallas_src>

<mosaic_0001>
module attributes {stable_mosaic.version = 11 : i64} {
  func.func @qnet_kernel(%arg0: i32, %arg1: memref<8x8xf32, #tpu.memory_space<vmem>>, %arg2: memref<136x128xf32, #tpu.memory_space<vmem>>, %arg3: memref<16x128xf32, #tpu.memory_space<vmem>>, %arg4: memref<8x128xf32, #tpu.memory_space<vmem>>) attributes {dimension_semantics = [#tpu.dimension_semantics<parallel>], iteration_bounds = array<i64: 1>, scalar_prefetch = 0 : i64, scratch_operands = 0 : i64, tpu.core_type = #tpu.core_type<tc>, window_params = [{transform_indices = @transform_0, window_bounds = array<i64: 8, 8>}, {pipeline_mode = #tpu.pipeline_mode<synchronous>, transform_indices = @transform_1, window_bounds = array<i64: 136, 128>}, {pipeline_mode = #tpu.pipeline_mode<synchronous>, transform_indices = @transform_2, window_bounds = array<i64: 16, 128>}, {transform_indices = @transform_3, window_bounds = array<i64: 8, 128>}]} {
    %c0 = arith.constant 0 : index
    %c0_0 = arith.constant 0 : index
    %0 = vector.load %arg1[%c0, %c0_0] : memref<8x8xf32, #tpu.memory_space<vmem>>, vector<8x8xf32>
    %c0_1 = arith.constant 0 : index
    %c0_2 = arith.constant 0 : index
    %1 = vector.load %arg2[%c0_1, %c0_2] : memref<136x128xf32, #tpu.memory_space<vmem>>, vector<8x64xf32>
    %c8 = arith.constant 8 : index
    %c0_3 = arith.constant 0 : index
    %2 = vector.load %arg2[%c8, %c0_3] : memref<136x128xf32, #tpu.memory_space<vmem>>, vector<64x32xf32>
    %c72 = arith.constant 72 : index
    %c0_4 = arith.constant 0 : index
    %3 = vector.load %arg2[%c72, %c0_4] : memref<136x128xf32, #tpu.memory_space<vmem>>, vector<32x32xf32>
    %c104 = arith.constant 104 : index
    %c0_5 = arith.constant 0 : index
    %4 = vector.load %arg2[%c104, %c0_5] : memref<136x128xf32, #tpu.memory_space<vmem>>, vector<32x128xf32>
    %c0_6 = arith.constant 0 : index
    %c0_7 = arith.constant 0 : index
    %5 = vector.load %arg3[%c0_6, %c0_7] : memref<16x128xf32, #tpu.memory_space<vmem>>, vector<1x64xf32>
    %c1 = arith.constant 1 : index
    %c0_8 = arith.constant 0 : index
    %6 = vector.load %arg3[%c1, %c0_8] : memref<16x128xf32, #tpu.memory_space<vmem>>, vector<1x64xf32>
    %c2 = arith.constant 2 : index
    %c0_9 = arith.constant 0 : index
    %7 = vector.load %arg3[%c2, %c0_9] : memref<16x128xf32, #tpu.memory_space<vmem>>, vector<1x64xf32>
    %c3 = arith.constant 3 : index
    %c0_10 = arith.constant 0 : index
    %8 = vector.load %arg3[%c3, %c0_10] : memref<16x128xf32, #tpu.memory_space<vmem>>, vector<1x32xf32>
    %c4 = arith.constant 4 : index
    %c0_11 = arith.constant 0 : index
    %9 = vector.load %arg3[%c4, %c0_11] : memref<16x128xf32, #tpu.memory_space<vmem>>, vector<1x32xf32>
    %c5 = arith.constant 5 : index
    %c0_12 = arith.constant 0 : index
    %10 = vector.load %arg3[%c5, %c0_12] : memref<16x128xf32, #tpu.memory_space<vmem>>, vector<1x32xf32>
    %c6 = arith.constant 6 : index
    %c0_13 = arith.constant 0 : index
    %11 = vector.load %arg3[%c6, %c0_13] : memref<16x128xf32, #tpu.memory_space<vmem>>, vector<1x32xf32>
    %c7 = arith.constant 7 : index
    %c0_14 = arith.constant 0 : index
    %12 = vector.load %arg3[%c7, %c0_14] : memref<16x128xf32, #tpu.memory_space<vmem>>, vector<1x32xf32>
    %c8_15 = arith.constant 8 : index
    %c0_16 = arith.constant 0 : index
    %13 = vector.load %arg3[%c8_15, %c0_16] : memref<16x128xf32, #tpu.memory_space<vmem>>, vector<1x32xf32>
    %c9 = arith.constant 9 : index
    %c0_17 = arith.constant 0 : index
    %14 = vector.load %arg3[%c9, %c0_17] : memref<16x128xf32, #tpu.memory_space<vmem>>, vector<1x128xf32>
    %c10 = arith.constant 10 : index
    %c0_18 = arith.constant 0 : index
    %15 = vector.load %arg3[%c10, %c0_18] : memref<16x128xf32, #tpu.memory_space<vmem>>, vector<1x32xf32>
    %c11 = arith.constant 11 : index
    %c0_19 = arith.constant 0 : index
    %16 = vector.load %arg3[%c11, %c0_19] : memref<16x128xf32, #tpu.memory_space<vmem>>, vector<1x32xf32>
    %c12 = arith.constant 12 : index
    %c0_20 = arith.constant 0 : index
    %17 = vector.load %arg3[%c12, %c0_20] : memref<16x128xf32, #tpu.memory_space<vmem>>, vector<1x128xf32>
    %c13 = arith.constant 13 : index
    %c0_21 = arith.constant 0 : index
    %18 = vector.load %arg3[%c13, %c0_21] : memref<16x128xf32, #tpu.memory_space<vmem>>, vector<1x128xf32>
    %cst = arith.constant dense<0.000000e+00> : vector<8x64xf32>
    %19 = tpu.matmul %0, %1, %cst {dimension_numbers = #tpu.dot_dimension_numbers<[1], [0], [0], [1], [0, 0, 1, 1], [], []>} : vector<8x8xf32>, vector<8x64xf32>, vector<8x64xf32> -> vector<8x64xf32>
    %20 = vector.broadcast %5 : vector<1x64xf32> to vector<8x64xf32>
    %21 = arith.addf %19, %20 : vector<8x64xf32>
    %cst_22 = arith.constant dense<0.000000e+00> : vector<8xf32>
    %22 = vector.multi_reduction <add>, %21, %cst_22 [1] : vector<8x64xf32> to vector<8xf32>
    %23 = vector.shape_cast %22 : vector<8xf32> to vector<8x1xf32>
    %cst_23 = arith.constant 6.400000e+01 : f32
    %24 = vector.broadcast %cst_23 : f32 to vector<8x1xf32>
    %25 = arith.divf %23, %24 : vector<8x1xf32>
    %26 = arith.mulf %21, %21 : vector<8x64xf32>
    %cst_24 = arith.constant dense<0.000000e+00> : vector<8xf32>
    %27 = vector.multi_reduction <add>, %26, %cst_24 [1] : vector<8x64xf32> to vector<8xf32>
    %28 = vector.shape_cast %27 : vector<8xf32> to vector<8x1xf32>
    %cst_25 = arith.constant 6.400000e+01 : f32
    %29 = vector.broadcast %cst_25 : f32 to vector<8x1xf32>
    %30 = arith.divf %28, %29 : vector<8x1xf32>
    %31 = arith.mulf %25, %25 : vector<8x1xf32>
    %32 = arith.subf %30, %31 : vector<8x1xf32>
    %33 = vector.broadcast %25 : vector<8x1xf32> to vector<8x64xf32>
    %34 = arith.subf %21, %33 : vector<8x64xf32>
    %cst_26 = arith.constant 9.99999974E-6 : f32
    %35 = vector.broadcast %cst_26 : f32 to vector<8x1xf32>
    %36 = arith.addf %32, %35 : vector<8x1xf32>
    %37 = math.rsqrt %36 : vector<8x1xf32>
    %38 = vector.broadcast %37 : vector<8x1xf32> to vector<8x64xf32>
    %39 = arith.mulf %34, %38 : vector<8x64xf32>
    %40 = vector.broadcast %6 : vector<1x64xf32> to vector<8x64xf32>
    %41 = arith.mulf %39, %40 : vector<8x64xf32>
    %42 = vector.broadcast %7 : vector<1x64xf32> to vector<8x64xf32>
    %43 = arith.addf %41, %42 : vector<8x64xf32>
    %cst_27 = arith.constant 0.000000e+00 : f32
    %44 = vector.broadcast %cst_27 : f32 to vector<8x64xf32>
    %45 = arith.maximumf %43, %44 : vector<8x64xf32>
    %cst_28 = arith.constant dense<0.000000e+00> : vector<8x32xf32>
    %46 = tpu.matmul %45, %2, %cst_28 {dimension_numbers = #tpu.dot_dimension_numbers<[1], [0], [0], [1], [0, 0, 1, 1], [], []>} : vector<8x64xf32>, vector<64x32xf32>, vector<8x32xf32> -> vector<8x32xf32>
    %47 = vector.broadcast %8 : vector<1x32xf32> to vector<8x32xf32>
    %48 = arith.addf %46, %47 : vector<8x32xf32>
    %cst_29 = arith.constant dense<0.000000e+00> : vector<8xf32>
    %49 = vector.multi_reduction <add>, %48, %cst_29 [1] : vector<8x32xf32> to vector<8xf32>
    %50 = vector.shape_cast %49 : vector<8xf32> to vector<8x1xf32>
    %cst_30 = arith.constant 3.200000e+01 : f32
    %51 = vector.broadcast %cst_30 : f32 to vector<8x1xf32>
    %52 = arith.divf %50, %51 : vector<8x1xf32>
    %53 = arith.mulf %48, %48 : vector<8x32xf32>
    %cst_31 = arith.constant dense<0.000000e+00> : vector<8xf32>
    %54 = vector.multi_reduction <add>, %53, %cst_31 [1] : vector<8x32xf32> to vector<8xf32>
    %55 = vector.shape_cast %54 : vector<8xf32> to vector<8x1xf32>
    %cst_32 = arith.constant 3.200000e+01 : f32
    %56 = vector.broadcast %cst_32 : f32 to vector<8x1xf32>
    %57 = arith.divf %55, %56 : vector<8x1xf32>
    %58 = arith.mulf %52, %52 : vector<8x1xf32>
    %59 = arith.subf %57, %58 : vector<8x1xf32>
    %60 = vector.broadcast %52 : vector<8x1xf32> to vector<8x32xf32>
    %61 = arith.subf %48, %60 : vector<8x32xf32>
    %cst_33 = arith.constant 9.99999974E-6 : f32
    %62 = vector.broadcast %cst_33 : f32 to vector<8x1xf32>
    %63 = arith.addf %59, %62 : vector<8x1xf32>
    %64 = math.rsqrt %63 : vector<8x1xf32>
    %65 = vector.broadcast %64 : vector<8x1xf32> to vector<8x32xf32>
    %66 = arith.mulf %61, %65 : vector<8x32xf32>
    %67 = vector.broadcast %9 : vector<1x32xf32> to vector<8x32xf32>
    %68 = arith.mulf %66, %67 : vector<8x32xf32>
    %69 = vector.broadcast %10 : vector<1x32xf32> to vector<8x32xf32>
    %70 = arith.addf %68, %69 : vector<8x32xf32>
    %cst_34 = arith.constant 0.000000e+00 : f32
    %71 = vector.broadcast %cst_34 : f32 to vector<8x32xf32>
    %72 = arith.maximumf %70, %71 : vector<8x32xf32>
    %cst_35 = arith.constant dense<0.000000e+00> : vector<8x32xf32>
    %73 = tpu.matmul %72, %3, %cst_35 {dimension_numbers = #tpu.dot_dimension_numbers<[1], [0], [0], [1], [0, 0, 1, 1], [], []>} : vector<8x32xf32>, vector<32x32xf32>, vector<8x32xf32> -> vector<8x32xf32>
    %74 = vector.broadcast %11 : vector<1x32xf32> to vector<8x32xf32>
    %75 = arith.addf %73, %74 : vector<8x32xf32>
    %76 = arith.mulf %75, %75 : vector<8x32xf32>
    %77 = vector.broadcast %15 : vector<1x32xf32> to vector<8x32xf32>
    %78 = arith.mulf %75, %77 : vector<8x32xf32>
    %cst_36 = arith.constant dense<0.000000e+00> : vector<8xf32>
    %79 = vector.multi_reduction <add>, %78, %cst_36 [1] : vector<8x32xf32> to vector<8xf32>
    %80 = vector.shape_cast %79 : vector<8xf32> to vector<8x1xf32>
    %cst_37 = arith.constant 6.250000e-02 : f32
    %81 = vector.broadcast %cst_37 : f32 to vector<8x1xf32>
    %82 = arith.mulf %80, %81 : vector<8x1xf32>
    %83 = vector.broadcast %16 : vector<1x32xf32> to vector<8x32xf32>
    %84 = arith.mulf %75, %83 : vector<8x32xf32>
    %cst_38 = arith.constant dense<0.000000e+00> : vector<8xf32>
    %85 = vector.multi_reduction <add>, %84, %cst_38 [1] : vector<8x32xf32> to vector<8xf32>
    %86 = vector.shape_cast %85 : vector<8xf32> to vector<8x1xf32>
    %cst_39 = arith.constant 6.250000e-02 : f32
    %87 = vector.broadcast %cst_39 : f32 to vector<8x1xf32>
    %88 = arith.mulf %86, %87 : vector<8x1xf32>
    %89 = vector.broadcast %15 : vector<1x32xf32> to vector<8x32xf32>
    %90 = arith.mulf %76, %89 : vector<8x32xf32>
    %cst_40 = arith.constant dense<0.000000e+00> : vector<8xf32>
    %91 = vector.multi_reduction <add>, %90, %cst_40 [1] : vector<8x32xf32> to vector<8xf32>
    %92 = vector.shape_cast %91 : vector<8xf32> to vector<8x1xf32>
    %cst_41 = arith.constant 6.250000e-02 : f32
    %93 = vector.broadcast %cst_41 : f32 to vector<8x1xf32>
    %94 = arith.mulf %92, %93 : vector<8x1xf32>
    %95 = arith.mulf %82, %82 : vector<8x1xf32>
    %96 = arith.subf %94, %95 : vector<8x1xf32>
    %97 = vector.broadcast %16 : vector<1x32xf32> to vector<8x32xf32>
    %98 = arith.mulf %76, %97 : vector<8x32xf32>
    %cst_42 = arith.constant dense<0.000000e+00> : vector<8xf32>
    %99 = vector.multi_reduction <add>, %98, %cst_42 [1] : vector<8x32xf32> to vector<8xf32>
    %100 = vector.shape_cast %99 : vector<8xf32> to vector<8x1xf32>
    %cst_43 = arith.constant 6.250000e-02 : f32
    %101 = vector.broadcast %cst_43 : f32 to vector<8x1xf32>
    %102 = arith.mulf %100, %101 : vector<8x1xf32>
    %103 = arith.mulf %88, %88 : vector<8x1xf32>
    %104 = arith.subf %102, %103 : vector<8x1xf32>
    %105 = vector.broadcast %82 : vector<8x1xf32> to vector<8x32xf32>
    %106 = vector.broadcast %15 : vector<1x32xf32> to vector<8x32xf32>
    %107 = arith.mulf %105, %106 : vector<8x32xf32>
    %108 = vector.broadcast %88 : vector<8x1xf32> to vector<8x32xf32>
    %109 = vector.broadcast %16 : vector<1x32xf32> to vector<8x32xf32>
    %110 = arith.mulf %108, %109 : vector<8x32xf32>
    %111 = arith.addf %107, %110 : vector<8x32xf32>
    %cst_44 = arith.constant 9.99999974E-6 : f32
    %112 = vector.broadcast %cst_44 : f32 to vector<8x1xf32>
    %113 = arith.addf %96, %112 : vector<8x1xf32>
    %114 = math.rsqrt %113 : vector<8x1xf32>
    %115 = vector.broadcast %114 : vector<8x1xf32> to vector<8x32xf32>
    %116 = vector.broadcast %15 : vector<1x32xf32> to vector<8x32xf32>
    %117 = arith.mulf %115, %116 : vector<8x32xf32>
    %cst_45 = arith.constant 9.99999974E-6 : f32
    %118 = vector.broadcast %cst_45 : f32 to vector<8x1xf32>
    %119 = arith.addf %104, %118 : vector<8x1xf32>
    %120 = math.rsqrt %119 : vector<8x1xf32>
    %121 = vector.broadcast %120 : vector<8x1xf32> to vector<8x32xf32>
    %122 = vector.broadcast %16 : vector<1x32xf32> to vector<8x32xf32>
    %123 = arith.mulf %121, %122 : vector<8x32xf32>
    %124 = arith.addf %117, %123 : vector<8x32xf32>
    %125 = arith.subf %75, %111 : vector<8x32xf32>
    %126 = arith.mulf %125, %124 : vector<8x32xf32>
    %127 = vector.broadcast %12 : vector<1x32xf32> to vector<8x32xf32>
    %128 = arith.mulf %126, %127 : vector<8x32xf32>
    %129 = vector.broadcast %13 : vector<1x32xf32> to vector<8x32xf32>
    %130 = arith.addf %128, %129 : vector<8x32xf32>
    %cst_46 = arith.constant 0.000000e+00 : f32
    %131 = vector.broadcast %cst_46 : f32 to vector<8x32xf32>
    %132 = arith.maximumf %130, %131 : vector<8x32xf32>
    %cst_47 = arith.constant dense<0.000000e+00> : vector<8x128xf32>
    %133 = tpu.matmul %132, %4, %cst_47 {dimension_numbers = #tpu.dot_dimension_numbers<[1], [0], [0], [1], [0, 0, 1, 1], [], []>} : vector<8x32xf32>, vector<32x128xf32>, vector<8x128xf32> -> vector<8x128xf32>
    %134 = vector.broadcast %14 : vector<1x128xf32> to vector<8x128xf32>
    %135 = arith.addf %133, %134 : vector<8x128xf32>
    %136 = vector.broadcast %18 : vector<1x128xf32> to vector<8x128xf32>
    %137 = arith.mulf %135, %136 : vector<8x128xf32>
    %cst_48 = arith.constant dense<0.000000e+00> : vector<8xf32>
    %138 = vector.multi_reduction <add>, %137, %cst_48 [1] : vector<8x128xf32> to vector<8xf32>
    %139 = vector.shape_cast %138 : vector<8xf32> to vector<8x1xf32>
    %140 = vector.broadcast %17 : vector<1x128xf32> to vector<8x128xf32>
    %141 = arith.mulf %135, %140 : vector<8x128xf32>
    %cst_49 = arith.constant dense<0.000000e+00> : vector<8xf32>
    %142 = vector.multi_reduction <add>, %141, %cst_49 [1] : vector<8x128xf32> to vector<8xf32>
    %143 = vector.shape_cast %142 : vector<8xf32> to vector<8x1xf32>
    %cst_50 = arith.constant 0.333333343 : f32
    %144 = vector.broadcast %cst_50 : f32 to vector<8x1xf32>
    %145 = arith.mulf %143, %144 : vector<8x1xf32>
    %146 = arith.subf %139, %145 : vector<8x1xf32>
    %147 = vector.broadcast %146 : vector<8x1xf32> to vector<8x128xf32>
    %148 = arith.addf %135, %147 : vector<8x128xf32>
    %c0_51 = arith.constant 0 : index
    %c0_52 = arith.constant 0 : index
    %149 = vector.load %arg4[%c0_51, %c0_52] : memref<8x128xf32, #tpu.memory_space<vmem>>, vector<8x128xf32>
    tpu.vector_store %arg4[%c0_51, %c0_52], %148 {strides = array<i32>} : memref<8x128xf32, #tpu.memory_space<vmem>>, vector<8x128xf32>,
    return
  }
  func.func @transform_0(%arg0: i32) -> (i32, i32) {
    %c0_i32 = arith.constant 0 : i32
    %c0_i32_0 = arith.constant 0 : i32
    return %arg0, %c0_i32 : i32, i32
  }
  func.func @transform_1(%arg0: i32) -> (i32, i32) {
    %c0_i32 = arith.constant 0 : i32
    %c0_i32_0 = arith.constant 0 : i32
    %c0_i32_1 = arith.constant 0 : i32
    return %c0_i32, %c0_i32_0 : i32, i32
  }
  func.func @transform_2(%arg0: i32) -> (i32, i32) {
    %c0_i32 = arith.constant 0 : i32
    %c0_i32_0 = arith.constant 0 : i32
    %c0_i32_1 = arith.constant 0 : i32
    return %c0_i32, %c0_i32_0 : i32, i32
  }
  func.func @transform_3(%arg0: i32) -> (i32, i32) {
    %c0_i32 = arith.constant 0 : i32
    %c0_i32_0 = arith.constant 0 : i32
    return %arg0, %c0_i32 : i32, i32
  }
}

</mosaic_0001>

<bundles_post_ra>
// kernel: tpu_custom_call.1
= control target key start
LH: loop header
LB: loop body
LE: loop exit
PB: predicated region body
PF: predicated region fallthrough
CT: control target
= control target key end

     0   :  { %8 = vsyncpa [#allocation3], 0  ;;  %s804_s0 = inlined_call_operand.hbm [shape: f32[8,8], index: 0, kind: input, shape index: {}]   ;;  %s805_s1 = inlined_call_operand.hbm [shape: f32[136,128], index: 1, kind: input, shape index: {}]   ;;  %s806_s2 = inlined_call_operand.hbm [shape: f32[16,128], index: 2, kind: input, shape index: {}]   ;;  %s807_s3 = inlined_call_operand.hbm [shape: f32[8,128], index: 3, kind: output, shape index: {}]  }
   0x1   :  { %9 = vsyncpa [#allocation6], 0 }
   0x2   :  { %10 = vsyncpa [#allocation4], 0  ;;  %s728_s12 = smov [#allocation5]  }
   0x3   :  { %s26_s13 = sshll.u32 %s728_s12, 4  ;;  %s27_s13 = int_to_ptr.vmem [resolvable:$true] %s26_s13 }
   0x4   :  { %s650_s14 = scalar_lea.vmem %s27_s13, 2176  ;;  %p655_p1 = scmp.lt.s32.totalorder %s27_s13, %s27_s13 }
   0x5   :  { %p651_p0 = scmp.ne.s32.totalorder %s27_s13, %s650_s14  ;;  %p656_p2 = scmp.lt.s32.totalorder %s650_s14, %s650_s14 }
   0x7   :  { %p657_p3 = por %p656_p2, %p655_p1 }
   0x9   :  { %p658_p4 = pnand %p657_p3, %p651_p0 }
   0xb   :  { %661 = shalt.err (!%p658_p4)
}
   0xc   :  { %s729_s15 = smov 128   ;;  %s730_s16 = smov 8  }
   0xd   :  { %32 = dma.hbm_to_vmem [thread:$0]  %s805_s1, 2176, %s27_s13, [#allocation6], %s729_s15, %s729_s15, %s730_s16  }
   0xe   :  { %s731_s19 = smov [#allocation2]   ;;  %s732_s21 = smov [#allocation7]  }
   0xf   :  { %s17_s20 = sshll.u32 %s731_s19, 4  ;;  %s38_s22 = sshll.u32 %s732_s21, 4  ;;  %s18_s20 = int_to_ptr.vmem [resolvable:$true] %s17_s20  ;;  %s39_s22 = int_to_ptr.vmem [resolvable:$true] %s38_s22 }
  0x10   :  { %s670_s23 = scalar_lea.vmem %s18_s20, 128  ;;  %p675_p6 = scmp.lt.s32.totalorder %s18_s20, %s18_s20 }
  0x11   :  { %p671_p5 = scmp.ne.s32.totalorder %s18_s20, %s670_s23  ;;  %p676_p7 = scmp.lt.s32.totalorder %s670_s23, %s670_s23 }
  0x13   :  { %p677_p8 = por %p676_p7, %p675_p6 }
  0x15   :  { %p678_p9 = pnand %p677_p8, %p671_p5 }
  0x17   :  { %681 = shalt.err (!%p678_p9)
}
  0x18   :  { %20 = dma.hbm_to_vmem [thread:$0]  %s804_s0, 128, %s18_s20, [#allocation3]  }
  0x19   :  { %s690_s26 = scalar_lea.vmem %s39_s22, 256  ;;  %p695_p11 = scmp.lt.s32.totalorder %s39_s22, %s39_s22 }
  0x1a   :  { %p691_p10 = scmp.ne.s32.totalorder %s39_s22, %s690_s26  ;;  %p696_p12 = scmp.lt.s32.totalorder %s690_s26, %s690_s26 }
  0x1c   :  { %p697_p13 = por %p696_p12, %p695_p11 }
  0x1e   :  { %p698_p0 = pnand %p697_p13, %p691_p10 }
  0x20   :  { %701 = shalt.err (!%p698_p0)
}
  0x21   :  { %44 = dma.hbm_to_vmem [thread:$0]  %s806_s2, 256, %s39_s22, [#allocation6], %s729_s15, %s729_s15, %s730_s16  }
  0x22   :  { %722 = dma.done.wait [#allocation3], 128  }
  0x23   :  { %723 = vsyncadd [#allocation3], 4294967168 }
  0x24   :  { %724 = dma.done.wait [#allocation6], 2432  }
  0x25   :  { %725 = vsyncadd [#allocation6], 4294964864  ;;  %v733_v0 = vmov 0.0   ;;  %vm734_vm0 = vmmov 0   ;;  %vm90_vm1 = vcmask 64512   ;;  %v55_v1 = vld [vmem:[#allocation5] sm:$0xff] }
  0x26   :  { %580 = vmatprep.subr.mxu0 %v733_v0  ;;  %582 = vmatprep.mubr.msk.f32.mxu0 %vm734_vm0, %v733_v0  ;;  %v54_v2 = vld [vmem:[#allocation2] sm:$0xff]  ;;  %v541_v3 = vld [vmem:[#allocation7] ss:$0 sm:$0xff]  ;;  %vm164_vm2 = vcmask 523264   ;;  %v63_v10 = vld [vmem:[#allocation5 + $0x40] sm:$0xff]  ;;  %vm269_vm3 = vcmask 261120  }
  0x27   :  { %585 = vmatprep.subr.mxu1 %v733_v0  ;;  %601 = vmatprep.mubr.msk.f32.mxu1 %vm734_vm0, %v733_v0  ;;  %v62_v11 = vld [vmem:[#allocation5 + $0x38] sm:$0xff]  ;;  %v61_v12 = vld [vmem:[#allocation5 + $0x30] sm:$0xff]  ;;  %v60_v13 = vld [vmem:[#allocation5 + $0x28] sm:$0xff]  ;;  %s735_s0 = smov [#allocation8]  }
  0x28   :  { %581 = vmatpush3.msra.mxu0 %v55_v1  ;;  %586 = vmatpush3.msra.mxu1 %v63_v10  ;;  %v59_v14 = vld [vmem:[#allocation5 + $0x20] sm:$0xff]  ;;  %v58_v15 = vld [vmem:[#allocation5 + $0x18] sm:$0xff]  ;;  %v57_v16 = vld [vmem:[#allocation5 + $0x10] sm:$0xff]  ;;  %s531_s2 = sshll.u32 %s735_s0, 4  ;;  %s532_s2 = int_to_ptr.vmem [resolvable:$true] %s531_s2 }
  0x29   :  { %583 = vmatmul.mubr.msk.f32.vlgmr.msra.gmra.mxu0 %vm90_vm1, %v54_v2  ;;  %604 = vmatprep.subr.mxu0 %v733_v0  ;;  %v56_v17 = vld [vmem:[#allocation5 + $0x8] sm:$0xff]  ;;  %v67_v40 = vld [vmem:[#allocation5 + $0x60] sm:$0xff]  ;;  %v66_v41 = vld [vmem:[#allocation5 + $0x58] sm:$0xff]  ;;  %s702_s28 = scalar_lea.vmem %s532_s2, 128  ;;  %p707_p2 = scmp.lt.s32.totalorder %s532_s2, %s532_s2 }
  0x2a   :  { %612 = vmatprep.mubr.msk.f32.mxu0 %vm734_vm0, %v733_v0  ;;  %587 = vmatprep.subr.mxu1 %v733_v0  ;;  %v543_v27 = vld [vmem:[#allocation7 + $0x1] ss:$0 sm:$0xff]  ;;  %v544_v29 = vld [vmem:[#allocation7 + $0x2] ss:$0 sm:$0xff]  ;;  %v545_v33 = vld [vmem:[#allocation7 + $0x3] ss:$0 sm:$0xff]  ;;  %p703_p1 = scmp.ne.s32.totalorder %s532_s2, %s702_s28  ;;  %p708_p3 = scmp.lt.s32.totalorder %s702_s28, %s702_s28 }
  0x2b   :  { %588 = vmatpush3.msra.mxu1 %v62_v11  ;;  %605 = vmatpush3.msra.mxu0 %v67_v40  ;;  %v65_v42 = vld [vmem:[#allocation5 + $0x50] sm:$0xff]  ;;  %v64_v43 = vld [vmem:[#allocation5 + $0x48] sm:$0xff]  ;;  %v71_v11 = vld [vmem:[#allocation5 + $0x80] sm:$0xff] }
  0x2c   :  { %589 = vmatprep.subr.mxu1 %v733_v0  ;;  %606 = vmatprep.subr.mxu0 %v733_v0  ;;  %v547_v53 = vld [vmem:[#allocation7 + $0x4] ss:$0 sm:$0xff]  ;;  %v548_v55 = vld [vmem:[#allocation7 + $0x5] ss:$0 sm:$0xff]  ;;  %v549_v59 = vld [vmem:[#allocation7 + $0x6] ss:$0 sm:$0xff]  ;;  %p709_p4 = por %p708_p3, %p707_p2 }
  0x2d   :  { %590 = vmatpush3.msra.mxu1 %v61_v12  ;;  %607 = vmatpush3.msra.mxu0 %v66_v41  ;;  %v552_v61 = vld [vmem:[#allocation7 + $0xb] ss:$0 sm:$0xff]  ;;  %v551_v62 = vld [vmem:[#allocation7 + $0xa] ss:$0 sm:$0xff]  ;;  %v70_v12 = vld [vmem:[#allocation5 + $0x78] sm:$0xff] }
  0x2e   :  { %591 = vmatprep.subr.mxu1 %v733_v0  ;;  %608 = vmatprep.subr.mxu0 %v733_v0  ;;  %p710_p5 = pnand %p709_p4, %p703_p1 }
  0x2f   :  { %592 = vmatpush3.msra.mxu1 %v60_v13  ;;  %609 = vmatpush3.msra.mxu0 %v65_v42  ;;  %v69_v13 = vld [vmem:[#allocation5 + $0x70] sm:$0xff] }
  0x30   :  { %593 = vmatprep.subr.mxu1 %v733_v0  ;;  %610 = vmatprep.subr.mxu0 %v733_v0 }
  0x31   :  { %594 = vmatpush3.msra.mxu1 %v59_v14  ;;  %611 = vmatpush3.msra.mxu0 %v64_v43  ;;  %v68_v14 = vld [vmem:[#allocation5 + $0x68] sm:$0xff]  ;;  %v555_v43 = vld [vmem:[#allocation7 + $0x9] ss:$0 sm:$0xff] }
  0x32   :  { %595 = vmatprep.subr.mxu1 %v733_v0  ;;  %615 = vmatprep.subr.mxu0 %v733_v0 }
  0x33   :  { %596 = vmatpush3.msra.mxu1 %v58_v15 }
  0x34   :  { %597 = vmatprep.subr.mxu1 %v733_v0 }
  0x35   :  { %598 = vmatpush3.msra.mxu1 %v57_v16 }
  0x36   :  { %599 = vmatprep.subr.mxu1 %v733_v0 }
  0x37   :  { %600 = vmatpush3.msra.mxu1 %v56_v17 }
  0xe9   :  { %v160_v4 = vpop.f32.mrf.mxu0 }
  0xea   :  { %v161_v5 = vadd.f32 %v541_v3, %v160_v4 }
  0xeb   :  { %v584_v6 = vpop.f32.mrf.mxu0 }
  0xec   :  { %v165_v7 = vsel %vm164_vm2, %v161_v5, 0.0  ;;  %v170_v8 = vmul.f32 %v161_v5, %v161_v5 }
  0xed   :  { %166 = vadd.xlane.f32.xlu0 %v165_v7 }
  0xee   :  { %v171_v9 = vsel %vm164_vm2, %v170_v8, 0.0 }
  0xf1   :  { %172 = vadd.xlane.f32.xlu0 %v171_v9 }
 0x176   :  { %v167_v18 = vpop.xlane.xlu0 %166 }
 0x177   :  { %v169_v19 = vmul.f32 0.015625, %v167_v18 }
 0x179   :  { %v175_v21 = vmul.f32 %v169_v19, %v169_v19  ;;  %v177_v25 = vsub.f32 %v161_v5, %v169_v19 }
 0x17a   :  { %v173_v20 = vpop.xlane.xlu0 %172 }
 0x17b   :  { %v174_v22 = vmul.f32 0.015625, %v173_v20 }
 0x17d   :  { %v176_v23 = vsub.f32 %v174_v22, %v175_v21 }
 0x17f   :  { %v178_v24 = vadd.f32 1e-05, %v176_v23 }
 0x181   :  { %634 = vrsqrt.f32 %v178_v24 }
 0x18e   :  { %v635_v26 = vpop.eup %634 }
 0x18f   :  { %v180_v28 = vmul.f32 %v635_v26, %v177_v25 }
 0x191   :  { %v185_v30 = vmul.f32 %v543_v27, %v180_v28 }
 0x193   :  { %v190_v31 = vadd.f32 %v544_v29, %v185_v30 }
 0x195   :  { %v191_v32 = vmax.f32 %v190_v31, 0.0 }
 0x197   :  { %602 = vmatmul.mubr.msk.f32.vlgmr.msra.gmra.mxu1 %vm164_vm2, %v191_v32 }
 0x257   :  { %v265_v34 = vpop.f32.mrf.mxu1 }
 0x258   :  { %v266_v35 = vadd.f32 %v545_v33, %v265_v34 }
 0x259   :  { %v603_v36 = vpop.f32.mrf.mxu1 }
 0x25a   :  { %v270_v37 = vsel %vm269_vm3, %v266_v35, 0.0  ;;  %v275_v38 = vmul.f32 %v266_v35, %v266_v35 }
 0x25b   :  { %271 = vadd.xlane.f32.xlu1 %v270_v37  ;;  %v553_v37 = vld [vmem:[#allocation7 + $0x7] ss:$0 sm:$0xff] }
 0x25c   :  { %v276_v39 = vsel %vm269_vm3, %v275_v38, 0.0 }
 0x25f   :  { %277 = vadd.xlane.f32.xlu1 %v276_v39  ;;  %v554_v39 = vld [vmem:[#allocation7 + $0x8] ss:$0 sm:$0xff] }
 0x2e4   :  { %v272_v44 = vpop.xlane.xlu1 %271 }
 0x2e5   :  { %v274_v45 = vmul.f32 0.03125, %v272_v44 }
 0x2e7   :  { %v280_v47 = vmul.f32 %v274_v45, %v274_v45  ;;  %v282_v51 = vsub.f32 %v266_v35, %v274_v45  ;;  %v558_v45 = vld [vmem:[#allocation7 + $0xc] ss:$0 sm:$0xff] }
 0x2e8   :  { %v278_v46 = vpop.xlane.xlu1 %277 }
 0x2e9   :  { %v279_v48 = vmul.f32 0.03125, %v278_v46  ;;  %v557_v46 = vld [vmem:[#allocation7 + $0xd] ss:$0 sm:$0xff] }
 0x2eb   :  { %v281_v49 = vsub.f32 %v279_v48, %v280_v47 }
 0x2ed   :  { %v283_v50 = vadd.f32 1e-05, %v281_v49 }
 0x2ef   :  { %636 = vrsqrt.f32 %v283_v50 }
 0x2fc   :  { %v637_v52 = vpop.eup %636 }
 0x2fd   :  { %v285_v54 = vmul.f32 %v637_v52, %v282_v51 }
 0x2ff   :  { %v290_v56 = vmul.f32 %v547_v53, %v285_v54 }
 0x301   :  { %v295_v57 = vadd.f32 %v548_v55, %v290_v56 }
 0x303   :  { %v296_v58 = vmax.f32 %v295_v57, 0.0 }
 0x305   :  { %613 = vmatmul.mubr.msk.f32.vlgmr.msra.gmra.mxu0 %vm269_vm3, %v296_v58 }
 0x306   :  { %623 = vmatprep.mubr.msk.f32.mxu0 %vm734_vm0, %v733_v0  ;;  %616 = vmatpush3.msra.mxu0 %v71_v11 }
 0x307   :  { %617 = vmatprep.subr.mxu0 %v733_v0 }
 0x308   :  { %618 = vmatpush3.msra.mxu0 %v70_v12 }
 0x309   :  { %619 = vmatprep.subr.mxu0 %v733_v0 }
 0x30a   :  { %620 = vmatpush3.msra.mxu0 %v69_v13 }
 0x30b   :  { %621 = vmatprep.subr.mxu0 %v733_v0 }
 0x30c   :  { %622 = vmatpush3.msra.mxu0 %v68_v14 }
 0x3c5   :  { %v370_v60 = vpop.f32.mrf.mxu0 }
 0x3c6   :  { %v371_v63 = vadd.f32 %v549_v59, %v370_v60 }
 0x3c7   :  { %v614_v1 = vpop.f32.mrf.mxu0 }
 0x3c8   :  { %v388_v2 = vmul.f32 %v552_v61, %v371_v63  ;;  %v379_v3 = vmul.f32 %v551_v62, %v371_v63  ;;  %v374_v4 = vmul.f32 %v371_v63, %v371_v63 }
 0x3ca   :  { %v389_v5 = vsel %vm269_vm3, %v388_v2, 0.0  ;;  %v380_v6 = vsel %vm269_vm3, %v379_v3, 0.0  ;;  %v400_v7 = vmul.f32 %v552_v61, %v374_v4  ;;  %v393_v8 = vmul.f32 %v551_v62, %v374_v4 }
 0x3cb   :  { %390 = vadd.xlane.f32.xlu1 %v389_v5  ;;  %381 = vadd.xlane.f32.xlu0 %v380_v6 }
 0x3cc   :  { %v401_v9 = vsel %vm269_vm3, %v400_v7, 0.0  ;;  %v394_v10 = vsel %vm269_vm3, %v393_v8, 0.0 }
 0x3cf   :  { %402 = vadd.xlane.f32.xlu1 %v401_v9  ;;  %395 = vadd.xlane.f32.xlu0 %v394_v10 }
 0x454   :  { %v391_v15 = vpop.xlane.xlu1 %390  ;;  %v382_v16 = vpop.xlane.xlu0 %381 }
 0x455   :  { %v392_v17 = vmul.f32 0.0625, %v391_v15  ;;  %v383_v18 = vmul.f32 0.0625, %v382_v16 }
 0x457   :  { %v405_v21 = vmul.f32 %v392_v17, %v392_v17  ;;  %v398_v22 = vmul.f32 %v383_v18, %v383_v18  ;;  %v408_v29 = vmul.f32 %v552_v61, %v392_v17  ;;  %v407_v30 = vmul.f32 %v551_v62, %v383_v18 }
 0x458   :  { %v403_v19 = vpop.xlane.xlu1 %402  ;;  %v396_v20 = vpop.xlane.xlu0 %395 }
 0x459   :  { %v404_v23 = vmul.f32 0.0625, %v403_v19  ;;  %v397_v24 = vmul.f32 0.0625, %v396_v20  ;;  %v409_v31 = vadd.f32 %v408_v29, %v407_v30 }
 0x45b   :  { %v406_v25 = vsub.f32 %v404_v23, %v405_v21  ;;  %v399_v26 = vsub.f32 %v397_v24, %v398_v22  ;;  %v417_v35 = vsub.f32 %v371_v63, %v409_v31 }
 0x45d   :  { %v413_v27 = vadd.f32 1e-05, %v406_v25  ;;  %v410_v28 = vadd.f32 1e-05, %v399_v26 }
 0x45f   :  { %638 = vrsqrt.f32 %v413_v27 }
 0x460   :  { %640 = vrsqrt.f32 %v410_v28 }
 0x46c   :  { %v639_v0 = vpop.eup %638 }
 0x46d   :  { %v641_v32 = vpop.eup %640  ;;  %v415_v33 = vmul.f32 %v639_v0, %v552_v61 }
 0x46e   :  { %v412_v34 = vmul.f32 %v641_v32, %v551_v62 }
 0x470   :  { %v416_v36 = vadd.f32 %v415_v33, %v412_v34 }
 0x472   :  { %v418_v38 = vmul.f32 %v417_v35, %v416_v36 }
 0x474   :  { %v423_v40 = vmul.f32 %v553_v37, %v418_v38 }
 0x476   :  { %v428_v41 = vadd.f32 %v554_v39, %v423_v40 }
 0x478   :  { %v429_v42 = vmax.f32 %v428_v41, 0.0 }
 0x47a   :  { %624 = vmatmul.mubr.msk.f32.vlgmr.msra.gmra.mxu0 %vm269_vm3, %v429_v42 }
 0x53a   :  { %v503_v44 = vpop.f32.mrf.mxu0 }
 0x53b   :  { %v504_v47 = vadd.f32 %v555_v43, %v503_v44 }
 0x53c   :  { %v625_v48 = vpop.f32.mrf.mxu0 }
 0x53d   :  { %v518_v49 = vmul.f32 %v558_v45, %v504_v47  ;;  %v511_v50 = vmul.f32 %v557_v46, %v504_v47 }
 0x53f   :  { %519 = vadd.xlane.f32.xlu0 %v518_v49  ;;  %512 = vadd.xlane.f32.xlu1 %v511_v50 }
 0x5c8   :  { %v520_v51 = vpop.xlane.xlu0 %519  ;;  %v513_v53 = vpop.xlane.xlu1 %512 }
 0x5c9   :  { %v521_v52 = vmul.f32 0.33333334, %v520_v51 }
 0x5cb   :  { %v522_v54 = vsub.f32 %v513_v53, %v521_v52 }
 0x5cd   :  { %v523_v55 = vadd.f32 %v522_v54, %v504_v47 }
 0x5cf   :  { %524 = vst [vmem:[#allocation8] sm:$0xff] %v523_v55 }
 0x5d0   :  { %713 = shalt.err (!%p710_p5)
}
 0x5d1   :  { %534 = dma.vmem_to_hbm [thread:$0]  %s532_s2, 128, %s807_s3, [#allocation4]  }
 0x5d2   :  { %726 = dma.done.wait [#allocation4], 128  }
 0x5d3   :  { %727 = vsyncadd [#allocation4], 4294967168 }
 0x5d4   :  { %538 = vsyncpa [#allocation3], 1 }
 0x5d5   :  { %539 = vsyncpa [#allocation6], 1 }
 0x5d6   :  { %540 = vsyncpa [#allocation4], 1 }

</bundles_post_ra>
